<compile_context>
chip_gen: v7x
topology: tpu7x:2x2x1
jax: 0.10.0
libtpu: 0.0.40
codegen_flags: <defaults>
</compile_context>

<pallas_src>
import functools

import jax
import jax.numpy as jnp
from jax.experimental import pallas as pl
from jax.experimental.pallas import tpu as pltpu

_LANE = 128
_ROW_ALIGN = 16  # bf16-friendly sublane multiple for row blocks


def _round_up(v, m):
    return ((v + m - 1) // m) * m


# --------------------------------------------------------------------------
# Kernels
# --------------------------------------------------------------------------
def _project_kernel(x_ref, w_ref, o_ref):
    # o = x @ W   (bf16 in, f32 accumulate, bf16 store)
    o_ref[...] = jnp.dot(
        x_ref[...], w_ref[...], preferred_element_type=jnp.float32
    ).astype(o_ref.dtype)


def _agg_relu_project_kernel(adj_ref, hw_ref, b_ref, wn_ref, o_ref):
    # h = relu(adj_blk @ hW + b)   -> dropout is identity in eval mode
    # o = h @ W_next               (pre-projected input of the next layer)
    h = jnp.dot(adj_ref[...], hw_ref[...], preferred_element_type=jnp.float32)
    h = jnp.maximum(h + b_ref[...], 0.0)
    o_ref[...] = jnp.dot(
        h.astype(wn_ref.dtype), wn_ref[...], preferred_element_type=jnp.float32
    ).astype(o_ref.dtype)


def _agg_log_softmax_kernel(adj_ref, hw_ref, b_ref, o_ref, *, nclass):
    # logits = adj_blk @ hW3 + b3 ; out = log_softmax over the real class lanes
    h = jnp.dot(adj_ref[...], hw_ref[...], preferred_element_type=jnp.float32)
    h = h + b_ref[...]
    col = jax.lax.broadcasted_iota(jnp.int32, h.shape, dimension=1)
    h = jnp.where(col < nclass, h, -1e30)  # mask padded class lanes
    m = jnp.max(h, axis=1, keepdims=True)
    s = h - m
    lse = jnp.log(jnp.sum(jnp.exp(s), axis=1, keepdims=True))
    o_ref[...] = (s - lse).astype(o_ref.dtype)


# --------------------------------------------------------------------------
# Wrapper
# --------------------------------------------------------------------------
def _pick_row_tile(n_rows, row_bytes):
    """Largest row block (multiple of 16, dividing n_rows) whose adj slab fits
    a per-buffer budget derived from the chip's VMEM capacity (double-buffered
    adj stream ~ VMEM/8)."""
    try:
        vmem_cap = pltpu.get_tpu_info().vmem_capacity_bytes
    except Exception:
        vmem_cap = 64 * 1024 * 1024  # conservative (v7x physical)
    target = max(512 * 1024, vmem_cap // 16)
    if n_rows % _ROW_ALIGN != 0:
        return n_rows  # tiny / odd graphs: single full block
    tm = (target // max(row_bytes, 1)) // _ROW_ALIGN * _ROW_ALIGN
    tm = min(n_rows, max(_ROW_ALIGN, tm))
    while n_rows % tm:
        tm -= _ROW_ALIGN
    return tm


def gcn_three_hop(x, adj, w1, b1, w2, b2, w3, b3, *, row_block=None):
    """Forward pass of GCN_three_hop (eval mode). Returns [N, nclass] f32."""
    N, nfeat = x.shape
    f1 = w1.shape[1]
    f2 = w2.shape[1]
    nclass = w3.shape[1]

    f0p, f1p, f2p, f3p = (_round_up(f, _LANE) for f in (nfeat, f1, f2, nclass))
    compute_dtype = jnp.bfloat16

    def pad2(a, rows, cols):
        a = jnp.asarray(a)
        if a.ndim == 1:
            a = a[None, :]
        return jnp.pad(a, ((0, rows - a.shape[0]), (0, cols - a.shape[1])))

    x_p = pad2(x, N, f0p).astype(compute_dtype)
    adj_b = jnp.asarray(adj).astype(compute_dtype)
    w1_p = pad2(w1, f0p, f1p).astype(compute_dtype)
    w2_p = pad2(w2, f1p, f2p).astype(compute_dtype)
    w3_p = pad2(w3, f2p, f3p).astype(compute_dtype)
    b1_p = pad2(b1, 1, f1p).astype(jnp.float32)
    b2_p = pad2(b2, 1, f2p).astype(jnp.float32)
    b3_p = pad2(b3, 1, f3p).astype(jnp.float32)

    if row_block is None:
        tm = _pick_row_tile(N, N * 2)  # bf16 adj row
    else:
        tm = int(row_block)
        assert N % tm == 0 and (tm == N or tm % _ROW_ALIGN == 0)
    grid = (N // tm,)

    # Explicit VMEM limit: double-buffered adj + out blocks, resident hW/W/b,
    # 2x headroom; clamped so it stays legal on v5e/v6e/v7x.
    fmax = max(f1p, f2p, f3p)
    need = (
        2 * tm * N * 2                # adj row blocks, double buffered (bf16)
        + 2 * tm * fmax * 4           # output blocks, double buffered
        + N * fmax * 2                # resident hW
        + max(f0p * f1p, f1p * f2p, f2p * f3p) * 2  # resident W
        + fmax * 4                    # bias
    )
    vmem_limit = int(min(56 << 20, max(32 << 20, 2 * need)))
    cparams = pltpu.CompilerParams(
        dimension_semantics=("parallel",),
        vmem_limit_bytes=vmem_limit,
    )

    def project(x_in, w, fin_p, fout_p):
        cost = pl.CostEstimate(
            flops=2 * N * fin_p * fout_p,
            transcendentals=0,
            bytes_accessed=(N * fin_p + fin_p * fout_p + N * fout_p) * 2,
        )
        return pl.pallas_call(
            _project_kernel,
            out_shape=jax.ShapeDtypeStruct((N, fout_p), compute_dtype),
            grid_spec=pltpu.PrefetchScalarGridSpec(
                num_scalar_prefetch=0,
                grid=grid,
                in_specs=[
                    pl.BlockSpec((tm, fin_p), lambda i: (i, 0)),
                    pl.BlockSpec((fin_p, fout_p), lambda i: (0, 0)),
                ],
                out_specs=pl.BlockSpec((tm, fout_p), lambda i: (i, 0)),
            ),
            compiler_params=cparams,
            cost_estimate=cost,
        )(x_in, w)

    def agg_relu_project(hw, b, w_next, f_cur, f_next):
        cost = pl.CostEstimate(
            flops=2 * N * N * f_cur + 2 * N * f_cur * f_next,
            transcendentals=0,
            bytes_accessed=N * N * 2
            + (N * f_cur + f_cur * f_next + N * f_next) * 2
            + f_cur * 4,
        )
        return pl.pallas_call(
            _agg_relu_project_kernel,
            out_shape=jax.ShapeDtypeStruct((N, f_next), compute_dtype),
            grid_spec=pltpu.PrefetchScalarGridSpec(
                num_scalar_prefetch=0,
                grid=grid,
                in_specs=[
                    pl.BlockSpec((tm, N), lambda i: (i, 0)),        # adj stream
                    pl.BlockSpec((N, f_cur), lambda i: (0, 0)),     # hW resident
                    pl.BlockSpec((1, f_cur), lambda i: (0, 0)),     # bias
                    pl.BlockSpec((f_cur, f_next), lambda i: (0, 0)),  # W_next
                ],
                out_specs=pl.BlockSpec((tm, f_next), lambda i: (i, 0)),
            ),
            compiler_params=cparams,
            cost_estimate=cost,
        )(adj_b, hw, b, w_next)

    def agg_log_softmax(hw, b, f_cur):
        cost = pl.CostEstimate(
            flops=2 * N * N * f_cur,
            transcendentals=N * f_cur,
            bytes_accessed=N * N * 2 + N * f_cur * 2 + f_cur * 4 + N * f_cur * 4,
        )
        return pl.pallas_call(
            functools.partial(_agg_log_softmax_kernel, nclass=nclass),
            out_shape=jax.ShapeDtypeStruct((N, f_cur), jnp.float32),
            grid_spec=pltpu.PrefetchScalarGridSpec(
                num_scalar_prefetch=0,
                grid=grid,
                in_specs=[
                    pl.BlockSpec((tm, N), lambda i: (i, 0)),
                    pl.BlockSpec((N, f_cur), lambda i: (0, 0)),
                    pl.BlockSpec((1, f_cur), lambda i: (0, 0)),
                ],
                out_specs=pl.BlockSpec((tm, f_cur), lambda i: (i, 0)),
            ),
            compiler_params=cparams,
            cost_estimate=cost,
        )(adj_b, hw, b)

    # layer 1..3 (dropout = identity in eval mode)
    hw1 = project(x_p, w1_p, f0p, f1p)                 # x @ W1         (once)
    hw2 = agg_relu_project(hw1, b1_p, w2_p, f1p, f2p)  # relu(adj@hW1+b1) @ W2
    hw3 = agg_relu_project(hw2, b2_p, w3_p, f2p, f3p)  # relu(adj@hW2+b2) @ W3
    out = agg_log_softmax(hw3, b3_p, f3p)              # log_softmax(adj@hW3+b3)
    return out[:, :nclass]


def _init_gc_params(key, fan_in, fan_out):
    # GraphConvolution-style init: uniform(-stdv, stdv), stdv = 1/sqrt(fan_out)
    kw, kb = jax.random.split(key)
    stdv = 1.0 / jnp.sqrt(jnp.float32(fan_out))
    w = jax.random.uniform(kw, (fan_in, fan_out), jnp.float32, -stdv, stdv)
    b = jax.random.uniform(kb, (1, fan_out), jnp.float32, -stdv, stdv)
    return w, b


if __name__ == "__main__":
    key = jax.random.PRNGKey(0)
    k_x, k_adj, k1, k2, k3 = jax.random.split(key, 5)

    # small shapes: N nodes, nfeat input features, nhid hidden, nclass classes
    N, nfeat, nhid, nclass = 64, 32, 16, 8

    x = jax.random.normal(k_x, (N, nfeat), jnp.float32)

    # symmetric row-normalized adjacency (with self loops)
    a = (jax.random.uniform(k_adj, (N, N)) < 0.1).astype(jnp.float32)
    a = jnp.maximum(a, a.T) + jnp.eye(N, dtype=jnp.float32)
    deg = jnp.sum(a, axis=1, keepdims=True)
    adj = a / deg

    w1, b1 = _init_gc_params(k1, nfeat, nhid * 2)
    w2, b2 = _init_gc_params(k2, nhid * 2, nhid)
    w3, b3 = _init_gc_params(k3, nhid, nclass)

    # row_block=16 -> grid=(4,) so the pipelined path is exercised at demo size
    out = gcn_three_hop(x, adj, w1, b1, w2, b2, w3, b3, row_block=16)
    out = jax.block_until_ready(out)
    assert out.shape == (N, nclass)

    # --- reference matching the kernel's bf16/f32 dtype flow (tight check) ---
    bf = jnp.bfloat16

    def bdot(a, b):
        return jnp.dot(a.astype(bf), b.astype(bf), preferred_element_type=jnp.float32)

    hw = bdot(x, w1).astype(bf)
    h = jnp.maximum(bdot(adj, hw) + b1, 0.0)
    hw = bdot(h, w2).astype(bf)
    h = jnp.maximum(bdot(adj, hw) + b2, 0.0)
    hw = bdot(h, w3).astype(bf)
    ref_b = jax.nn.log_softmax(bdot(adj, hw) + b3, axis=1)

    # --- pure-f32 module reference (loose check; kernel uses bf16 compute) ---
    h = jnp.maximum(adj @ (x @ w1) + b1, 0.0)
    h = jnp.maximum(adj @ (h @ w2) + b2, 0.0)
    ref_f = jax.nn.log_softmax(adj @ (h @ w3) + b3, axis=1)

    assert jnp.allclose(out, ref_b, atol=2e-3, rtol=2e-3), float(
        jnp.max(jnp.abs(out - ref_b))
    )
    assert jnp.allclose(out, ref_f, atol=1e-1, rtol=1e-1), float(
        jnp.max(jnp.abs(out - ref_f))
    )

    print("KERNEL_OK")
</pallas_src>

<mosaic_0001>
module attributes {stable_mosaic.version = 11 : i64} {
  func.func @_project_kernel(%arg0: i32, %arg1: memref<16x128xbf16, #tpu.memory_space<vmem>>, %arg2: memref<128x128xbf16, #tpu.memory_space<vmem>>, %arg3: memref<16x128xbf16, #tpu.memory_space<vmem>>) attributes {dimension_semantics = [#tpu.dimension_semantics<parallel>], iteration_bounds = array<i64: 4>, scalar_prefetch = 0 : i64, scratch_operands = 0 : i64, tpu.core_type = #tpu.core_type<tc>, window_params = [{transform_indices = @transform_0, window_bounds = array<i64: 16, 128>}, {pipeline_mode = #tpu.pipeline_mode<synchronous>, transform_indices = @transform_1, window_bounds = array<i64: 128, 128>}, {transform_indices = @transform_2, window_bounds = array<i64: 16, 128>}]} {
    %c0 = arith.constant 0 : index
    %c0_0 = arith.constant 0 : index
    %0 = vector.load %arg1[%c0, %c0_0] : memref<16x128xbf16, #tpu.memory_space<vmem>>, vector<16x128xbf16>
    %c0_1 = arith.constant 0 : index
    %c0_2 = arith.constant 0 : index
    %1 = vector.load %arg2[%c0_1, %c0_2] : memref<128x128xbf16, #tpu.memory_space<vmem>>, vector<128x128xbf16>
    %cst = arith.constant dense<0.000000e+00> : vector<16x128xf32>
    %2 = tpu.matmul %0, %1, %cst {dimension_numbers = #tpu.dot_dimension_numbers<[1], [0], [0], [1], [0, 0, 1, 1], [], []>} : vector<16x128xbf16>, vector<128x128xbf16>, vector<16x128xf32> -> vector<16x128xf32>
    %3 = arith.truncf %2 : vector<16x128xf32> to vector<16x128xbf16>
    %c0_3 = arith.constant 0 : index
    %c0_4 = arith.constant 0 : index
    %4 = vector.load %arg3[%c0_3, %c0_4] : memref<16x128xbf16, #tpu.memory_space<vmem>>, vector<16x128xbf16>
    tpu.vector_store %arg3[%c0_3, %c0_4], %3 {strides = array<i32>} : memref<16x128xbf16, #tpu.memory_space<vmem>>, vector<16x128xbf16>,
    return
  }
  func.func @transform_0(%arg0: i32) -> (i32, i32) {
    %c0_i32 = arith.constant 0 : i32
    %c0_i32_0 = arith.constant 0 : i32
    return %arg0, %c0_i32 : i32, i32
  }
  func.func @transform_1(%arg0: i32) -> (i32, i32) {
    %c0_i32 = arith.constant 0 : i32
    %c0_i32_0 = arith.constant 0 : i32
    %c0_i32_1 = arith.constant 0 : i32
    return %c0_i32, %c0_i32_0 : i32, i32
  }
  func.func @transform_2(%arg0: i32) -> (i32, i32) {
    %c0_i32 = arith.constant 0 : i32
    %c0_i32_0 = arith.constant 0 : i32
    return %arg0, %c0_i32 : i32, i32
  }
}

</mosaic_0001>

<bundles_post_ra>
// kernel: tpu_custom_call.1
= control target key start
LH: loop header
LB: loop body
LE: loop exit
PB: predicated region body
PF: predicated region fallthrough
CT: control target
= control target key end

     0   :  { %7 = vsyncpa [#allocation3], 0  ;;  %s896_s0 = inlined_call_operand.hbm [shape: bf16[64,128], index: 0, kind: input, shape index: {}]   ;;  %s897_s1 = inlined_call_operand.hbm [shape: bf16[128,128], index: 1, kind: input, shape index: {}]   ;;  %s898_s2 = inlined_call_operand.hbm [shape: bf16[64,128], index: 2, kind: output, shape index: {}]  }
   0x1   :  { %9 = vsyncpa [#allocation3 + $0x1], 0 }
   0x2   :  { %10 = vsyncpa [#allocation6], 0 }
   0x3   :  { %11 = vsyncpa [#allocation4], 0 }
   0x4   :  { %13 = vsyncpa [#allocation4 + $0x1], 0  ;;  %s691_s9 = smov 0   ;;  %s693_s10 = smov 0  }
   0x5   :  { %s695_s11 = smov 0   ;;  %s697_s12 = smov 0  }
   0x6 LB: > { %s712_s13 = sadd.s32 4294967295, %s665_s12   ;;  %s400_s14 = sadd.s32 4294967294, %s665_s12   ;;  %s665_s12 = sphi %s697_s12, %s917_s12   ;;  %s661_s11 = sphi %s695_s11, %s916_s11   ;;  %s657_s10 = sphi %s693_s10, %s915_s10   ;;  %s653_s9 = sphi %s691_s9, %s914_s9  }
   0x7   : > { %p39_p0 = scmp.ne.s32.totalorder %s657_s10, %s653_s9  ;;  %p899_p1 = scmp.eq.s32.totalorder %s712_s13, 0 }
   0x8   : > { %p90_p3 = scmp.eq.s32.totalorder %s400_s14, 3  ;;  %p401_p5 = scmp.ge.s32.totalorder %s665_s12, 1 }
   0x9   : > { %p721_p4 = por %p899_p1, %p39_p0  ;;  %p97_p7 = scmp.lt.s32.totalorder %s665_s12, 5 }
   0xa   : > { %p726_p6 = por %p90_p3, %p39_p0  ;;  %s667_s18 = smov [#allocation5]  }
   0xb   : > { %s902_s15 = scalar_select %p721_p4, 1, 0 }
   0xc   : > { %s903_s16 = scalar_select %p726_p6, 1, 0 }
   0xd   : > { %p731_p8 = pnand %p401_p5, %p97_p7  ;;  %s109_s19 = sshll.u32 %s667_s18, 4  ;;  %s110_s19 = int_to_ptr.vmem [resolvable:$true] %s109_s19 }
   0xe   : > { %s744_s21 = sadd.s32 1, %s665_s12   ;;  %s26_s22 = sadd.s32 1, %s661_s11 }
   0xf   : > { %s904_s17 = scalar_select %p731_p8, 1, 0 }
  0x10   : > { %p473_p9 = pneg %p731_p8  ;;  %s23_s23 = ssub.s32 %s665_s12, %s744_s21 }
  0x11   : > { %s537_s26 = scalar_lea.hbm %s897_s1, 1024 }
  0x12   : > { %p739_p10 = pnand %p473_p9, %p899_p1  ;;  %p538_p11 = scmp.ne.s32.totalorder %s897_s1, %s537_s26 }
  0x13   : > { %p544_p3 = scmp.lt.u32.totalorder %s537_s26, %s897_s1 }
  0x14   : > { %p539_p12 = pneg %p739_p10 }
  0x16   : > { %p540_p13 = pnand %p539_p12, %p538_p11 }
  0x18   : > { %p541_p0 = pneg %p540_p13 }
  0x1a   : > { %p546_p5 = pnand %p544_p3, %p541_p0 }
  0x1c   : > { %549 = shalt.err (!%p546_p5)
}
  0x1d   : > { %s550_s3 = scalar_lea.vmem %s110_s19, 1024  ;;  %p558_p2 = scmp.lt.s32.totalorder %s110_s19, %s110_s19 }
  0x1e   : > { %p551_p7 = scmp.ne.s32.totalorder %s110_s19, %s550_s3  ;;  %p559_p6 = scmp.lt.s32.totalorder %s550_s3, %s550_s3 }
  0x20   : > { %p553_p9 = pnand %p551_p7, %p539_p12  ;;  %p560_p4 = por %p559_p6, %p558_p2 }
  0x22   : > { %p554_p1 = pneg %p553_p9 }
  0x24   : > { %p561_p8 = pnand %p560_p4, %p554_p1 }
  0x26   : > { %564 = shalt.err (!%p561_p8)
}
  0x27   : > { %s668_s4 = smov 64   ;;  %s669_s5 = smov 4  }
  0x28   : > { %476 = dma.hbm_to_vmem [thread:$0]  (!%p739_p10), %s897_s1, 1024, %s110_s19, [#allocation6], %s668_s4, %s668_s4, %s669_s5  }
  0x29   : > { %p24_p1 = scmp.eq.s32.totalorder %s23_s23, 0  ;;  %p33_p2 = scmp.ne.s32.totalorder %s661_s11, %s657_s10 }
  0x2a   : > { %p34_p4 = scmp.eq.s32.totalorder %s665_s12, 0  ;;  %p486_p6 = scmp.lt.s32.totalorder %s665_s12, 4 }
  0x2b   : > { %s773_s8 = scalar_select %p24_p1, %s661_s11, %s26_s22  }
  0x2c   : > { %p35_p8 = por %p34_p4, %p33_p2  ;;  %p906_p11 = scmp.eq.s32.totalorder %s712_s13, 3 }
  0x2d   : > { %s123_s18 = sand.u32 1, %s661_s11   ;;  %s427_s20 = sshll.u32 %s665_s12, 7 }
  0x2e   : > { %p777_p12 = por %p906_p11, %p33_p2  ;;  %s404_s24 = sshll.u32 %s123_s18, 3 }
  0x2f   : > { %s786_s27 = scalar_lea.hbm %s896_s0, %s427_s20  ;;  %s127_s19 = scalar_lea.vmem [#allocation2], %s404_s24 }
  0x30   : > { %s134_s22 = sshll.u32 %s127_s19, 4  ;;  %p788_p10 = pnand %p486_p6, %p35_p8  ;;  %s792_s22 = int_to_ptr.vmem [resolvable:$true] %s134_s22 }
  0x31   : > { %s794_s28 = scalar_lea.sflag [#allocation3], %s123_s18  ;;  %s565_s29 = scalar_lea.hbm %s786_s27, 128 }
  0x32   : > { %p566_p13 = scmp.ne.s32.totalorder %s786_s27, %s565_s29  ;;  %p567_p0 = pneg %p788_p10 }
  0x33   : > { %s570_s6 = scalar_lea.hbm %s896_s0, 512  ;;  %p571_p7 = scmp.lt.u32.totalorder %s786_s27, %s896_s0 }
  0x34   : > { %p568_p3 = pnand %p567_p0, %p566_p13  ;;  %p572_p9 = scmp.lt.u32.totalorder %s570_s6, %s565_s29 }
  0x35   : > { %p574_p2 = scmp.lt.u32.totalorder %s565_s29, %s786_s27 }
  0x36   : > { %p569_p5 = pneg %p568_p3  ;;  %p573_p1 = por %p572_p9, %p571_p7 }
  0x38   : > { %p575_p4 = por %p574_p2, %p573_p1 }
  0x3a   : > { %p576_p6 = pnand %p575_p4, %p569_p5 }
  0x3c   : > { %579 = shalt.err (!%p576_p6)
}
  0x3d   : > { %s580_s18 = scalar_lea.vmem %s792_s22, 128  ;;  %s670_s24 = smov [#allocation2]  }
  0x3e   : > { %p581_p8 = scmp.ne.s32.totalorder %s792_s22, %s580_s18  ;;  %s585_s25 = sshll.u32 %s670_s24, 4  ;;  %s586_s25 = int_to_ptr.vmem [resolvable:$false] %s585_s25 }
  0x3f   : > { %s587_s26 = scalar_lea.vmem %s586_s25, 256  ;;  %p588_p3 = scmp.lt.s32.totalorder %s792_s22, %s586_s25 }
  0x40   : > { %p583_p11 = pnand %p581_p8, %p567_p0  ;;  %p589_p7 = scmp.lt.s32.totalorder %s587_s26, %s580_s18 }
  0x42   : > { %p584_p13 = pneg %p583_p11  ;;  %p590_p9 = por %p589_p7, %p588_p3 }
  0x44   : > { %p591_p1 = pnand %p590_p9, %p584_p13 }
  0x46   : > { %594 = shalt.err (!%p591_p1)
}
  0x47   : > { %480 = dma.hbm_to_vmem [thread:$0]  (!%p788_p10), %s786_s27, 128, %s792_s22, %s794_s28, %s668_s4, %s668_s4, %s669_s5  }
  0x48   : > { %p909_p0 = scmp.ne.s32.totalorder %s904_s17, 0 }
  0x49   : > { %s828_s19 = sand.u32 (!%p909_p0), 1, %s657_s10   ;;  %p910_p5 = scmp.ne.s32.totalorder (!%p909_p0), %s902_s15, 0 }
  0x4a   : > { %146 = sbr.rel (%p909_p0) target bundleno = 349 (0x15d), region = 28  ;;  %s408_s29 = sshll.u32 (!%p909_p0), %s828_s19, 3 }
  0x4b   : > { %s149_s30 = scalar_lea.sflag (!%p909_p0), [#allocation3], %s828_s19  ;;  %s834_s23 = scalar_lea.vmem (!%p909_p0), [#allocation2], %s408_s29 }
  0x51   : > { %640 = dma.done.wait (%p910_p5), %s149_s30, 128  }
  0x52   : > { %642 = vsyncadd (%p910_p5), %s149_s30, 4294967168  ;;  %p911_p10 = scmp.eq.s32.totalorder %s712_s13, 0 }
  0x54   : > { %644 = dma.done.wait (%p911_p10), [#allocation6], 1024   ;;  %p912_p2 = pmov %p911_p10 }
  0x55   : > { %v671_v0 = vmov 0.0   ;;  %vm672_vm0 = vmmov 0   ;;  %v528_v1 = vld [vmem:[#allocation5] sm:$0xff]   ;;  %v529_v2 = vld [vmem:[#allocation5 + $0x8] sm:$0xff]   ;;  %v530_v3 = vld [vmem:[#allocation5 + $0x10] sm:$0xff]   ;;  %s176_s15 = scalar_lea.vmem [#allocation7], %s408_s29 }
  0x56   : > { %646 = vsyncadd (%p912_p2), [#allocation6], 4294966272  ;;  %445 = vmatprep.subr.bf16.mxu0 %v671_v0  ;;  %461 = vmatprep.mubr.msk.bf16.mxu0 %vm672_vm0, %v671_v0  ;;  %v531_v4 = vld [vmem:[#allocation5 + $0x18] sm:$0xff]   ;;  %v532_v5 = vld [vmem:[#allocation5 + $0x20] sm:$0xff]   ;;  %s317_s17 = sshll.u32 %s176_s15, 4  ;;  %s430_s4 = sshll.u32 %s712_s13, 7  ;;  %s848_s17 = int_to_ptr.vmem [resolvable:$true] %s317_s17 }
  0x57   : > { %446 = vmatpush3.bf16.msra.mxu0 %v528_v1  ;;  %v533_v6 = vld [vmem:[#allocation5 + $0x28] sm:$0xff]   ;;  %v534_v7 = vld [vmem:[#allocation5 + $0x30] sm:$0xff]   ;;  %v535_v8 = vld [vmem:[#allocation5 + $0x38] sm:$0xff]   ;;  %s853_s22 = scalar_lea.hbm %s898_s2, %s430_s4  ;;  %s304_s28 = scalar_lea.sflag [#allocation4], %s828_s19 }
  0x58   : > { %447 = vmatprep.subr.bf16.mxu0 %v671_v0  ;;  %v536_v9 = vld [vmem:[%s834_s23] sm:$0xff]   ;;  %s595_s3 = scalar_lea.vmem %s848_s17, 128  ;;  %s673_s13 = smov [#allocation7]  }
  0x59   : > { %p596_p4 = scmp.ne.s32.totalorder %s848_s17, %s595_s3  ;;  %s599_s6 = sshll.u32 %s673_s13, 4  ;;  %s600_s6 = int_to_ptr.vmem [resolvable:$false] %s599_s6 }
  0x5a   : > { %s601_s7 = scalar_lea.vmem %s600_s6, 256  ;;  %p602_p11 = scmp.lt.s32.totalorder %s848_s17, %s600_s6 }
  0x5b   : > { %448 = vmatpush3.bf16.msra.mxu0 %v529_v2  ;;  %p597_p6 = pnand %p596_p4, %p777_p12  ;;  %p603_p13 = scmp.lt.s32.totalorder %s601_s7, %s595_s3 }
  0x5c   : > { %449 = vmatprep.subr.bf16.mxu0 %v671_v0 }
  0x5d   : > { %p598_p8 = pneg %p597_p6  ;;  %p604_p3 = por %p603_p13, %p602_p11 }
  0x5f   : > { %450 = vmatpush3.bf16.msra.mxu0 %v530_v3  ;;  %p605_p7 = pnand %p604_p3, %p598_p8 }
  0x60   : > { %451 = vmatprep.subr.bf16.mxu0 %v671_v0 }
  0x63   : > { %452 = vmatpush3.bf16.msra.mxu0 %v531_v4 }
  0x64   : > { %453 = vmatprep.subr.bf16.mxu0 %v671_v0 }
  0x67   : > { %454 = vmatpush3.bf16.msra.mxu0 %v532_v5 }
  0x68   : > { %455 = vmatprep.subr.bf16.mxu0 %v671_v0 }
  0x6b   : > { %456 = vmatpush3.bf16.msra.mxu0 %v533_v6 }
  0x6c   : > { %457 = vmatprep.subr.bf16.mxu0 %v671_v0 }
  0x6f   : > { %458 = vmatpush3.bf16.msra.mxu0 %v534_v7 }
  0x70   : > { %459 = vmatprep.subr.bf16.mxu0 %v671_v0 }
  0x73   : > { %460 = vmatpush3.bf16.msra.mxu0 %v535_v8 }
  0x76   : > { %462 = vmatmul.mubr.bf16.vlgmr.msra.gmra.mrb[0].mxu0 %v536_v9 }
 0x149   : > { %v286_v10 = vpop.f32.mrb[0].mxu0 }
 0x14a   : > { %v463_v11 = vpop.f32.mrb[1].mxu0 }
 0x14b   : > { %v289_v12 = vpop.f32.mrb[2].mxu0 }
 0x14c   : > { %v434_v13 = vpack.c.bf16 %v289_v12, %v286_v10  ;;  %v464_v14 = vpop.f32.mrb[3].mxu0 }
 0x14e   : > { %435 = vst [vmem:[%s176_s15] sm:$0xff] %v434_v13  }
 0x14f   : > { %608 = shalt.err (!%p605_p7)
}
 0x150   : > { %s609_s20 = scalar_lea.hbm %s853_s22, 128  ;;  %s613_s25 = scalar_lea.hbm %s898_s2, 512 }
 0x151   : > { %p610_p9 = scmp.ne.s32.totalorder %s853_s22, %s609_s20  ;;  %p614_p5 = scmp.lt.u32.totalorder %s853_s22, %s898_s2 }
 0x152   : > { %p615_p10 = scmp.lt.u32.totalorder %s613_s25, %s609_s20  ;;  %p617_p4 = scmp.lt.u32.totalorder %s609_s20, %s853_s22 }
 0x153   : > { %p611_p1 = pnand %p610_p9, %p777_p12 }
 0x154   : > { %p616_p2 = por %p615_p10, %p614_p5 }
 0x155   : > { %p612_p0 = pneg %p611_p1 }
 0x156   : > { %p618_p6 = por %p617_p4, %p616_p2 }
 0x158   : > { %p619_p8 = pnand %p618_p6, %p612_p0 }
 0x15a   : > { %622 = shalt.err (!%p619_p8)
}
 0x15b   : > { %s674_s30 = smov 64   ;;  %s675_s23 = smov 4  }
 0x15c   : > { %471 = dma.vmem_to_hbm [thread:$0]  (%p777_p12), %s848_s17, 128, %s853_s22, %s304_s28, %s674_s30, %s674_s30, %s675_s23  }
 0x15d PF: > { %p488_p11 = scmp.ge.s32.totalorder %s665_s12, 2  ;;  %s332_s15 = sand.u32 1, %s653_s9  }
 0x15e   : > { %p913_p13 = scmp.ne.s32.totalorder %s903_s16, 0  ;;  %s333_s4 = scalar_lea.sflag [#allocation4], %s332_s15 }
 0x160   : > { %p482_p3 = pnand %p488_p11, %p913_p13 }
 0x162   : > { %648 = dma.done.wait (!%p482_p3), %s333_s4, 128  }
 0x163   : > { %650 = vsyncadd (!%p482_p3), %s333_s4, 4294967168  ;;  %p16_p7 = scmp.ge.s32.totalorder %s744_s21, 6   ;;  %s914_s9 = smov %s657_s10 }
 0x164   : > { %s915_s10 = smov %s661_s11  ;;  %s916_s11 = smov %s773_s8 }
 0x165   : > { %s917_s12 = smov %s744_s21  ;;  %18 = sbr.rel (!%p16_p7) target bundleno = 6 (0x6), region = 77 }
 0x16c   :  { %338 = vsyncpa [#allocation3], 1 }
 0x16d   :  { %340 = vsyncpa [#allocation3 + $0x1], 1 }
 0x16e   :  { %341 = vsyncpa [#allocation6], 1 }
 0x16f   :  { %342 = vsyncpa [#allocation4], 1 }
 0x170   :  { %344 = vsyncpa [#allocation4 + $0x1], 1 }

</bundles_post_ra>
